<compile_context>
chip_gen: v7x
topology: tpu7x:2x2x1
jax: 0.10.0
libtpu: 0.0.40
codegen_flags: <defaults>
</compile_context>

<pallas_src>
import numpy as np
import jax
import jax.numpy as jnp
from jax import lax
from jax.experimental import pallas as pl
from jax.experimental.pallas import tpu as pltpu

_HIGHEST = lax.Precision.HIGHEST   # used only by the pure-JAX reference


def _batch_tile(B):
    # Cap the tile at 128 (keeps padded VMEM intermediates small, v7x incl.)
    # and aim for >= 2 grid steps so both v7x TensorCores get work.
    half = (B + 1) // 2
    return min(128, max(8, ((half + 7) // 8) * 8))


# ----------------------------------------------------------------------------
# Full forward: Pallas fused kernel + tiny JAX glue for the embedding gathers.
# ----------------------------------------------------------------------------
def pallas_forward(x_nume, x_cate, params):
    B, H, W = x_nume.shape
    C1 = params["conv1_w"].shape[-1]            # 32
    C2 = params["conv2_w"].shape[-1]            # 64
    H2, W2 = H - 2, W - 2                       # conv2 output spatial size
    PH, PW = H2 // 2, W2 // 2                   # pooled spatial size
    S2 = H2 * W2
    F = C2 * PH * PW                            # flattened conv features

    # TODO(synk): embedding gather (tiny, data-dependent) stays in plain JAX.
    embeds = jnp.concatenate(
        [jnp.take(params["emb"][i], x_cate[:, i], axis=0)
         for i in range(len(params["emb"]))], axis=1).astype(jnp.float32)   # (B, E)
    E = embeds.shape[1]

    # ---------------- parameter prep (pure layout work) ----------------
    w1tap = params["conv1_w"].reshape(4, C1).astype(jnp.float32)        # (2,2,1,C1)->(4,C1)
    # Block-diagonal conv1 weight: Wbd[t*4 + t', t*C1 + c] = w1tap[t', c]
    wbd = jnp.kron(jnp.eye(4, dtype=jnp.float32), w1tap).astype(jnp.bfloat16)   # (16, 4*C1)
    cb1 = jnp.tile(params["conv1_b"].astype(jnp.float32), 4).reshape(1, 4 * C1)
    w2c = params["conv2_w"].reshape(4 * C1, C2).astype(jnp.bfloat16)    # rows (tap, c1)
    cb2 = params["conv2_b"].reshape(1, C2).astype(jnp.float32)

    lin1_w = params["lin1_w"].astype(jnp.float32)                       # (F+E, N1)
    N1 = lin1_w.shape[1]
    # nn.Flatten() on NCHW orders conv features (c, pi, pj); regroup rows to
    # (p, c) so they match the lane-concatenated pooled features in-kernel.
    w1conv = lin1_w[:F].reshape(C2, PH * PW, N1).transpose(1, 0, 2).reshape(F, N1)
    w1emb = lin1_w[F:]                                                  # (E, N1)
    b1 = params["lin1_b"].reshape(1, N1).astype(jnp.float32)
    w2 = params["lin2_w"].astype(jnp.float32)
    b2 = params["lin2_b"].reshape(1, -1).astype(jnp.float32)
    N2 = w2.shape[1]
    w3 = params["lin3_w"].astype(jnp.float32)
    b3 = params["lin3_b"].reshape(1, -1).astype(jnp.float32)
    NO = w3.shape[1]
    NOP = ((NO + 127) // 128) * 128             # lane-dense output width
    w3p = jnp.pad(w3, ((0, 0), (0, NOP - NO)))
    b3p = jnp.pad(b3, ((0, 0), (0, NOP - NO)))

    # ---------------- batch tiling ----------------
    TB = _batch_tile(B)
    Bp = ((B + TB - 1) // TB) * TB
    nb = Bp // TB

    xp = x_nume.astype(jnp.float32)
    ep = embeds
    if Bp != B:
        xp = jnp.pad(xp, ((0, Bp - B), (0, 0), (0, 0)))
        ep = jnp.pad(ep, ((0, Bp - B), (0, 0)))

    # 16-wide im2col over the fused conv1->conv2 3x3 receptive field,
    # column order k = (ti*2+tj)*4 + (ti'*2+tj').  Shipped as bf16: the MXU
    # rounds to bf16 under DEFAULT precision anyway; halves HBM/VMEM traffic.
    cols = []
    for ti in range(2):
        for tj in range(2):
            for tip in range(2):
                for tjp in range(2):
                    cols.append(xp[:, ti + tip: ti + tip + H2,
                                      tj + tjp: tj + tjp + W2])          # (Bp, H2, W2)
    xcat = jnp.stack(cols, axis=-1).reshape(Bp, S2, 16)
    # Rows within a batch tile ordered (spatial, batch-in-tile) so the kernel
    # needs no reshape at all; the leading dim is the grid axis.
    xcat = (xcat.reshape(nb, TB, S2, 16).transpose(0, 2, 1, 3)
                 .reshape(nb, S2 * TB, 16).astype(jnp.bfloat16))

    # ---------------- fused kernel ----------------
    def kernel(xcat_ref, emb_ref, wbd_ref, cb1_ref, w2c_ref, cb2_ref,
               w1c_ref, w1e_ref, b1_ref, w2_ref, b2_ref, w3_ref, b3_ref,
               out_ref):
        # conv1 (+bias+ReLU) as ONE K=16 matmul; g's columns are already the
        # lane-concatenated conv2 im2col (ordered (conv2-tap, C1)).
        g = jnp.dot(xcat_ref[...], wbd_ref[...],
                    preferred_element_type=jnp.float32)
        g = jnp.maximum(g + cb1_ref[...], 0.0).astype(jnp.bfloat16)   # (S2*TB, 4*C1)
        # conv2 as ONE fat-K (K = 4*C1 = 128) matmul.
        # NOTE: no ReLU after conv2 -- matches the PyTorch forward exactly.
        c2 = jnp.dot(g, w2c_ref[...],
                     preferred_element_type=jnp.float32) + cb2_ref[...]   # (S2*TB, C2)

        # maxpool 2x2 / stride 2: rows for spatial (i, j) sit at sublane
        # offset (i*W2 + j)*TB -- multiples of TB (multiple of 8), so these
        # are tile-aligned slices, no relayout.
        pieces = []
        for pi in range(PH):
            for pj in range(PW):
                m = None
                for di in range(2):
                    for dj in range(2):
                        r0 = ((2 * pi + di) * W2 + (2 * pj + dj)) * TB
                        blk = c2[r0:r0 + TB, :]
                        m = blk if m is None else jnp.maximum(m, blk)
                pieces.append(m)                                      # (TB, C2)
        feat = jnp.concatenate(pieces, axis=1)                        # (TB, F) lane-concat

        # lin1: one fat-K (K = F = 576) dot + a small K=E dot for embeddings.
        h = jnp.dot(feat, w1c_ref[...], preferred_element_type=jnp.float32)
        h = h + jnp.dot(emb_ref[...], w1e_ref[...],
                        preferred_element_type=jnp.float32)
        h = jnp.maximum(h + b1_ref[...], 0.0)                         # (TB, N1)
        h = jnp.maximum(jnp.dot(h, w2_ref[...],
                                preferred_element_type=jnp.float32) + b2_ref[...],
                        0.0)                                          # (TB, N2)
        out_ref[...] = (jnp.dot(h, w3_ref[...],
                                preferred_element_type=jnp.float32)
                        + b3_ref[...])                                # (TB, NOP) lane-dense

    const2 = lambda b: (0, 0)
    out = pl.pallas_call(
        kernel,
        out_shape=jax.ShapeDtypeStruct((Bp, NOP), jnp.float32),
        grid=(nb,),
        in_specs=[
            pl.BlockSpec((None, S2 * TB, 16), lambda b: (b, 0, 0)),   # im2col input
            pl.BlockSpec((TB, E), lambda b: (b, 0)),                  # embeddings
            pl.BlockSpec((16, 4 * C1), const2),                       # wbd
            pl.BlockSpec((1, 4 * C1), const2),                        # cb1 (tiled)
            pl.BlockSpec((4 * C1, C2), const2),                       # w2c
            pl.BlockSpec((1, C2), const2),                            # cb2
            pl.BlockSpec((F, N1), const2),                            # lin1 conv rows
            pl.BlockSpec((E, N1), const2),                            # lin1 emb rows
            pl.BlockSpec((1, N1), const2),                            # b1
            pl.BlockSpec((N1, N2), const2),                           # w2
            pl.BlockSpec((1, N2), const2),                            # b2
            pl.BlockSpec((N2, NOP), const2),                          # w3 (padded)
            pl.BlockSpec((1, NOP), const2),                           # b3 (padded)
        ],
        out_specs=pl.BlockSpec((TB, NOP), lambda b: (b, 0)),
        compiler_params=pltpu.CompilerParams(
            dimension_semantics=("parallel",),
            vmem_limit_bytes=40 * 1024 * 1024,
        ),
    )(xcat, ep, wbd, cb1, w2c, cb2, w1conv, w1emb, b1, w2, b2, w3p, b3p)

    return out[:B, :NO]


# ----------------------------------------------------------------------------
# Pure-JAX reference (mirrors the PyTorch forward) for the correctness check.
# ----------------------------------------------------------------------------
def reference_forward(x_nume, x_cate, params):
    x = x_nume[:, None, :, :].astype(jnp.float32)  # NCHW
    y = lax.conv_general_dilated(x, params["conv1_w"], (1, 1), "VALID",
                                 dimension_numbers=("NCHW", "HWIO", "NCHW"),
                                 precision=_HIGHEST)
    y = jax.nn.relu(y + params["conv1_b"].reshape(1, -1, 1, 1))
    y = lax.conv_general_dilated(y, params["conv2_w"], (1, 1), "VALID",
                                 dimension_numbers=("NCHW", "HWIO", "NCHW"),
                                 precision=_HIGHEST)
    y = y + params["conv2_b"].reshape(1, -1, 1, 1)
    y = lax.reduce_window(y, -jnp.inf, lax.max, (1, 1, 2, 2), (1, 1, 2, 2), "VALID")
    flat = y.reshape(y.shape[0], -1)
    embeds = jnp.concatenate(
        [jnp.take(params["emb"][i], x_cate[:, i], axis=0)
         for i in range(len(params["emb"]))], axis=1)
    h = jnp.concatenate([flat, embeds], axis=1)
    h = jax.nn.relu(jnp.dot(h, params["lin1_w"], precision=_HIGHEST) + params["lin1_b"])
    h = jax.nn.relu(jnp.dot(h, params["lin2_w"], precision=_HIGHEST) + params["lin2_b"])
    return jnp.dot(h, params["lin3_w"], precision=_HIGHEST) + params["lin3_b"]


def make_params(key, H, W, cate_feat_num, cate_embed_dim, cate_unique_num):
    C1, C2 = 32, 64
    PH, PW = (H - 2) // 2, (W - 2) // 2
    flat_dim = C2 * PH * PW + cate_feat_num * cate_embed_dim
    ks = jax.random.split(key, 16)
    s = 0.1
    params = {
        "conv1_w": s * jax.random.normal(ks[0], (2, 2, 1, C1), jnp.float32),   # HWIO
        "conv1_b": s * jax.random.normal(ks[1], (C1,), jnp.float32),
        "conv2_w": s * jax.random.normal(ks[2], (2, 2, C1, C2), jnp.float32),  # HWIO
        "conv2_b": s * jax.random.normal(ks[3], (C2,), jnp.float32),
        "lin1_w": s * jax.random.normal(ks[4], (flat_dim, 128), jnp.float32),
        "lin1_b": s * jax.random.normal(ks[5], (128,), jnp.float32),
        "lin2_w": s * jax.random.normal(ks[6], (128, 64), jnp.float32),
        "lin2_b": s * jax.random.normal(ks[7], (64,), jnp.float32),
        "lin3_w": s * jax.random.normal(ks[8], (64, 2), jnp.float32),
        "lin3_b": s * jax.random.normal(ks[9], (2,), jnp.float32),
        "emb": [s * jax.random.normal(ks[10 + i],
                                      (cate_unique_num[i] + 1, cate_embed_dim),
                                      jnp.float32)
                for i in range(cate_feat_num)],
    }
    return params


if __name__ == "__main__":
    B, H, W = 2, 8, 8
    cate_feat_num, cate_embed_dim = 3, 8
    cate_unique_num = [1664, 216, 2500]

    key = jax.random.PRNGKey(0)
    k_param, k_nume, k_cate = jax.random.split(key, 3)
    params = make_params(k_param, H, W, cate_feat_num, cate_embed_dim, cate_unique_num)

    x_nume = jax.random.normal(k_nume, (B, H, W), jnp.float32)
    cate_keys = jax.random.split(k_cate, cate_feat_num)
    x_cate = jnp.stack(
        [jax.random.randint(cate_keys[i], (B,), 0, cate_unique_num[i] + 1)
         for i in range(cate_feat_num)], axis=1).astype(jnp.int32)     # (B, 3)

    logits = pallas_forward(x_nume, x_cate, params)
    logits = jax.block_until_ready(logits)

    ref = jax.block_until_ready(reference_forward(x_nume, x_cate, params))
    # Kernel uses DEFAULT MXU precision (bf16 passes, f32 accumulation) per the
    # performance review; compare against the HIGHEST-precision reference with
    # correspondingly loosened tolerances.
    np.testing.assert_allclose(np.asarray(logits), np.asarray(ref),
                               rtol=2e-2, atol=2e-2)
    assert logits.shape == (B, 2)
    print("KERNEL_OK")
</pallas_src>

<mosaic_0001>
module attributes {stable_mosaic.version = 11 : i64} {
  func.func @kernel(%arg0: i32, %arg1: memref<1x288x16xbf16, #tpu.memory_space<vmem>>, %arg2: memref<8x24xf32, #tpu.memory_space<vmem>>, %arg3: memref<16x128xbf16, #tpu.memory_space<vmem>>, %arg4: memref<1x128xf32, #tpu.memory_space<vmem>>, %arg5: memref<128x64xbf16, #tpu.memory_space<vmem>>, %arg6: memref<1x64xf32, #tpu.memory_space<vmem>>, %arg7: memref<576x128xf32, #tpu.memory_space<vmem>>, %arg8: memref<24x128xf32, #tpu.memory_space<vmem>>, %arg9: memref<1x128xf32, #tpu.memory_space<vmem>>, %arg10: memref<128x64xf32, #tpu.memory_space<vmem>>, %arg11: memref<1x64xf32, #tpu.memory_space<vmem>>, %arg12: memref<64x128xf32, #tpu.memory_space<vmem>>, %arg13: memref<1x128xf32, #tpu.memory_space<vmem>>, %arg14: memref<8x128xf32, #tpu.memory_space<vmem>>) attributes {dimension_semantics = [#tpu.dimension_semantics<parallel>], iteration_bounds = array<i64: 1>, scalar_prefetch = 0 : i64, scratch_operands = 0 : i64, tpu.core_type = #tpu.core_type<tc>, window_params = [{transform_indices = @transform_0, window_bounds = array<i64: 1, 288, 16>}, {transform_indices = @transform_1, window_bounds = array<i64: 8, 24>}, {pipeline_mode = #tpu.pipeline_mode<synchronous>, transform_indices = @transform_2, window_bounds = array<i64: 16, 128>}, {pipeline_mode = #tpu.pipeline_mode<synchronous>, transform_indices = @transform_3, window_bounds = array<i64: 1, 128>}, {pipeline_mode = #tpu.pipeline_mode<synchronous>, transform_indices = @transform_4, window_bounds = array<i64: 128, 64>}, {pipeline_mode = #tpu.pipeline_mode<synchronous>, transform_indices = @transform_5, window_bounds = array<i64: 1, 64>}, {pipeline_mode = #tpu.pipeline_mode<synchronous>, transform_indices = @transform_6, window_bounds = array<i64: 576, 128>}, {pipeline_mode = #tpu.pipeline_mode<synchronous>, transform_indices = @transform_7, window_bounds = array<i64: 24, 128>}, {pipeline_mode = #tpu.pipeline_mode<synchronous>, transform_indices = @transform_8, window_bounds = array<i64: 1, 128>}, {pipeline_mode = #tpu.pipeline_mode<synchronous>, transform_indices = @transform_9, window_bounds = array<i64: 128, 64>}, {pipeline_mode = #tpu.pipeline_mode<synchronous>, transform_indices = @transform_10, window_bounds = array<i64: 1, 64>}, {pipeline_mode = #tpu.pipeline_mode<synchronous>, transform_indices = @transform_11, window_bounds = array<i64: 64, 128>}, {pipeline_mode = #tpu.pipeline_mode<synchronous>, transform_indices = @transform_12, window_bounds = array<i64: 1, 128>}, {transform_indices = @transform_13, window_bounds = array<i64: 8, 128>}]} {
    %c0 = arith.constant 0 : index
    %c0_0 = arith.constant 0 : index
    %c0_1 = arith.constant 0 : index
    %0 = vector.load %arg1[%c0, %c0_0, %c0_1] : memref<1x288x16xbf16, #tpu.memory_space<vmem>>, vector<1x288x16xbf16>
    %1 = vector.shape_cast %0 : vector<1x288x16xbf16> to vector<288x16xbf16>
    %c0_2 = arith.constant 0 : index
    %c0_3 = arith.constant 0 : index
    %2 = vector.load %arg3[%c0_2, %c0_3] : memref<16x128xbf16, #tpu.memory_space<vmem>>, vector<16x128xbf16>
    %cst = arith.constant dense<0.000000e+00> : vector<288x128xf32>
    %3 = tpu.matmul %1, %2, %cst {dimension_numbers = #tpu.dot_dimension_numbers<[1], [0], [0], [1], [0, 0, 1, 1], [], []>} : vector<288x16xbf16>, vector<16x128xbf16>, vector<288x128xf32> -> vector<288x128xf32>
    %c0_4 = arith.constant 0 : index
    %c0_5 = arith.constant 0 : index
    %4 = vector.load %arg4[%c0_4, %c0_5] : memref<1x128xf32, #tpu.memory_space<vmem>>, vector<1x128xf32>
    %5 = vector.broadcast %4 : vector<1x128xf32> to vector<288x128xf32>
    %6 = arith.addf %3, %5 : vector<288x128xf32>
    %cst_6 = arith.constant 0.000000e+00 : f32
    %7 = vector.broadcast %cst_6 : f32 to vector<288x128xf32>
    %8 = arith.maximumf %6, %7 : vector<288x128xf32>
    %9 = arith.truncf %8 : vector<288x128xf32> to vector<288x128xbf16>
    %c0_7 = arith.constant 0 : index
    %c0_8 = arith.constant 0 : index
    %10 = vector.load %arg5[%c0_7, %c0_8] : memref<128x64xbf16, #tpu.memory_space<vmem>>, vector<128x64xbf16>
    %cst_9 = arith.constant dense<0.000000e+00> : vector<288x64xf32>
    %11 = tpu.matmul %9, %10, %cst_9 {dimension_numbers = #tpu.dot_dimension_numbers<[1], [0], [0], [1], [0, 0, 1, 1], [], []>} : vector<288x128xbf16>, vector<128x64xbf16>, vector<288x64xf32> -> vector<288x64xf32>
    %c0_10 = arith.constant 0 : index
    %c0_11 = arith.constant 0 : index
    %12 = vector.load %arg6[%c0_10, %c0_11] : memref<1x64xf32, #tpu.memory_space<vmem>>, vector<1x64xf32>
    %13 = vector.broadcast %12 : vector<1x64xf32> to vector<288x64xf32>
    %14 = arith.addf %11, %13 : vector<288x64xf32>
    %15 = vector.extract_strided_slice %14 {offsets = [0, 0], sizes = [8, 64], strides = [1, 1]} : vector<288x64xf32> to vector<8x64xf32>
    %16 = vector.extract_strided_slice %14 {offsets = [8, 0], sizes = [8, 64], strides = [1, 1]} : vector<288x64xf32> to vector<8x64xf32>
    %17 = arith.maximumf %15, %16 : vector<8x64xf32>
    %18 = vector.extract_strided_slice %14 {offsets = [48, 0], sizes = [8, 64], strides = [1, 1]} : vector<288x64xf32> to vector<8x64xf32>
    %19 = arith.maximumf %17, %18 : vector<8x64xf32>
    %20 = vector.extract_strided_slice %14 {offsets = [56, 0], sizes = [8, 64], strides = [1, 1]} : vector<288x64xf32> to vector<8x64xf32>
    %21 = arith.maximumf %19, %20 : vector<8x64xf32>
    %22 = vector.extract_strided_slice %14 {offsets = [16, 0], sizes = [8, 64], strides = [1, 1]} : vector<288x64xf32> to vector<8x64xf32>
    %23 = vector.extract_strided_slice %14 {offsets = [24, 0], sizes = [8, 64], strides = [1, 1]} : vector<288x64xf32> to vector<8x64xf32>
    %24 = arith.maximumf %22, %23 : vector<8x64xf32>
    %25 = vector.extract_strided_slice %14 {offsets = [64, 0], sizes = [8, 64], strides = [1, 1]} : vector<288x64xf32> to vector<8x64xf32>
    %26 = arith.maximumf %24, %25 : vector<8x64xf32>
    %27 = vector.extract_strided_slice %14 {offsets = [72, 0], sizes = [8, 64], strides = [1, 1]} : vector<288x64xf32> to vector<8x64xf32>
    %28 = arith.maximumf %26, %27 : vector<8x64xf32>
    %29 = vector.extract_strided_slice %14 {offsets = [32, 0], sizes = [8, 64], strides = [1, 1]} : vector<288x64xf32> to vector<8x64xf32>
    %30 = vector.extract_strided_slice %14 {offsets = [40, 0], sizes = [8, 64], strides = [1, 1]} : vector<288x64xf32> to vector<8x64xf32>
    %31 = arith.maximumf %29, %30 : vector<8x64xf32>
    %32 = vector.extract_strided_slice %14 {offsets = [80, 0], sizes = [8, 64], strides = [1, 1]} : vector<288x64xf32> to vector<8x64xf32>
    %33 = arith.maximumf %31, %32 : vector<8x64xf32>
    %34 = vector.extract_strided_slice %14 {offsets = [88, 0], sizes = [8, 64], strides = [1, 1]} : vector<288x64xf32> to vector<8x64xf32>
    %35 = arith.maximumf %33, %34 : vector<8x64xf32>
    %36 = vector.extract_strided_slice %14 {offsets = [96, 0], sizes = [8, 64], strides = [1, 1]} : vector<288x64xf32> to vector<8x64xf32>
    %37 = vector.extract_strided_slice %14 {offsets = [104, 0], sizes = [8, 64], strides = [1, 1]} : vector<288x64xf32> to vector<8x64xf32>
    %38 = arith.maximumf %36, %37 : vector<8x64xf32>
    %39 = vector.extract_strided_slice %14 {offsets = [144, 0], sizes = [8, 64], strides = [1, 1]} : vector<288x64xf32> to vector<8x64xf32>
    %40 = arith.maximumf %38, %39 : vector<8x64xf32>
    %41 = vector.extract_strided_slice %14 {offsets = [152, 0], sizes = [8, 64], strides = [1, 1]} : vector<288x64xf32> to vector<8x64xf32>
    %42 = arith.maximumf %40, %41 : vector<8x64xf32>
    %43 = vector.extract_strided_slice %14 {offsets = [112, 0], sizes = [8, 64], strides = [1, 1]} : vector<288x64xf32> to vector<8x64xf32>
    %44 = vector.extract_strided_slice %14 {offsets = [120, 0], sizes = [8, 64], strides = [1, 1]} : vector<288x64xf32> to vector<8x64xf32>
    %45 = arith.maximumf %43, %44 : vector<8x64xf32>
    %46 = vector.extract_strided_slice %14 {offsets = [160, 0], sizes = [8, 64], strides = [1, 1]} : vector<288x64xf32> to vector<8x64xf32>
    %47 = arith.maximumf %45, %46 : vector<8x64xf32>
    %48 = vector.extract_strided_slice %14 {offsets = [168, 0], sizes = [8, 64], strides = [1, 1]} : vector<288x64xf32> to vector<8x64xf32>
    %49 = arith.maximumf %47, %48 : vector<8x64xf32>
    %50 = vector.extract_strided_slice %14 {offsets = [128, 0], sizes = [8, 64], strides = [1, 1]} : vector<288x64xf32> to vector<8x64xf32>
    %51 = vector.extract_strided_slice %14 {offsets = [136, 0], sizes = [8, 64], strides = [1, 1]} : vector<288x64xf32> to vector<8x64xf32>
    %52 = arith.maximumf %50, %51 : vector<8x64xf32>
    %53 = vector.extract_strided_slice %14 {offsets = [176, 0], sizes = [8, 64], strides = [1, 1]} : vector<288x64xf32> to vector<8x64xf32>
    %54 = arith.maximumf %52, %53 : vector<8x64xf32>
    %55 = vector.extract_strided_slice %14 {offsets = [184, 0], sizes = [8, 64], strides = [1, 1]} : vector<288x64xf32> to vector<8x64xf32>
    %56 = arith.maximumf %54, %55 : vector<8x64xf32>
    %57 = vector.extract_strided_slice %14 {offsets = [192, 0], sizes = [8, 64], strides = [1, 1]} : vector<288x64xf32> to vector<8x64xf32>
    %58 = vector.extract_strided_slice %14 {offsets = [200, 0], sizes = [8, 64], strides = [1, 1]} : vector<288x64xf32> to vector<8x64xf32>
    %59 = arith.maximumf %57, %58 : vector<8x64xf32>
    %60 = vector.extract_strided_slice %14 {offsets = [240, 0], sizes = [8, 64], strides = [1, 1]} : vector<288x64xf32> to vector<8x64xf32>
    %61 = arith.maximumf %59, %60 : vector<8x64xf32>
    %62 = vector.extract_strided_slice %14 {offsets = [248, 0], sizes = [8, 64], strides = [1, 1]} : vector<288x64xf32> to vector<8x64xf32>
    %63 = arith.maximumf %61, %62 : vector<8x64xf32>
    %64 = vector.extract_strided_slice %14 {offsets = [208, 0], sizes = [8, 64], strides = [1, 1]} : vector<288x64xf32> to vector<8x64xf32>
    %65 = vector.extract_strided_slice %14 {offsets = [216, 0], sizes = [8, 64], strides = [1, 1]} : vector<288x64xf32> to vector<8x64xf32>
    %66 = arith.maximumf %64, %65 : vector<8x64xf32>
    %67 = vector.extract_strided_slice %14 {offsets = [256, 0], sizes = [8, 64], strides = [1, 1]} : vector<288x64xf32> to vector<8x64xf32>
    %68 = arith.maximumf %66, %67 : vector<8x64xf32>
    %69 = vector.extract_strided_slice %14 {offsets = [264, 0], sizes = [8, 64], strides = [1, 1]} : vector<288x64xf32> to vector<8x64xf32>
    %70 = arith.maximumf %68, %69 : vector<8x64xf32>
    %71 = vector.extract_strided_slice %14 {offsets = [224, 0], sizes = [8, 64], strides = [1, 1]} : vector<288x64xf32> to vector<8x64xf32>
    %72 = vector.extract_strided_slice %14 {offsets = [232, 0], sizes = [8, 64], strides = [1, 1]} : vector<288x64xf32> to vector<8x64xf32>
    %73 = arith.maximumf %71, %72 : vector<8x64xf32>
    %74 = vector.extract_strided_slice %14 {offsets = [272, 0], sizes = [8, 64], strides = [1, 1]} : vector<288x64xf32> to vector<8x64xf32>
    %75 = arith.maximumf %73, %74 : vector<8x64xf32>
    %76 = vector.extract_strided_slice %14 {offsets = [280, 0], sizes = [8, 64], strides = [1, 1]} : vector<288x64xf32> to vector<8x64xf32>
    %77 = arith.maximumf %75, %76 : vector<8x64xf32>
    %78 = tpu.concatenate %21, %28, %35, %42, %49, %56, %63, %70, %77 in 1 : vector<8x64xf32>, vector<8x64xf32>, vector<8x64xf32>, vector<8x64xf32>, vector<8x64xf32>, vector<8x64xf32>, vector<8x64xf32>, vector<8x64xf32>, vector<8x64xf32> -> vector<8x576xf32>
    %c0_12 = arith.constant 0 : index
    %c0_13 = arith.constant 0 : index
    %79 = vector.load %arg7[%c0_12, %c0_13] : memref<576x128xf32, #tpu.memory_space<vmem>>, vector<576x128xf32>
    %cst_14 = arith.constant dense<0.000000e+00> : vector<8x128xf32>
    %80 = tpu.matmul %78, %79, %cst_14 {dimension_numbers = #tpu.dot_dimension_numbers<[1], [0], [0], [1], [0, 0, 1, 1], [], []>} : vector<8x576xf32>, vector<576x128xf32>, vector<8x128xf32> -> vector<8x128xf32>
    %c0_15 = arith.constant 0 : index
    %c0_16 = arith.constant 0 : index
    %81 = vector.load %arg2[%c0_15, %c0_16] : memref<8x24xf32, #tpu.memory_space<vmem>>, vector<8x24xf32>
    %c0_17 = arith.constant 0 : index
    %c0_18 = arith.constant 0 : index
    %82 = vector.load %arg8[%c0_17, %c0_18] : memref<24x128xf32, #tpu.memory_space<vmem>>, vector<24x128xf32>
    %cst_19 = arith.constant dense<0.000000e+00> : vector<8x128xf32>
    %83 = tpu.matmul %81, %82, %cst_19 {dimension_numbers = #tpu.dot_dimension_numbers<[1], [0], [0], [1], [0, 0, 1, 1], [], []>} : vector<8x24xf32>, vector<24x128xf32>, vector<8x128xf32> -> vector<8x128xf32>
    %84 = arith.addf %80, %83 : vector<8x128xf32>
    %c0_20 = arith.constant 0 : index
    %c0_21 = arith.constant 0 : index
    %85 = vector.load %arg9[%c0_20, %c0_21] : memref<1x128xf32, #tpu.memory_space<vmem>>, vector<1x128xf32>
    %86 = vector.broadcast %85 : vector<1x128xf32> to vector<8x128xf32>
    %87 = arith.addf %84, %86 : vector<8x128xf32>
    %cst_22 = arith.constant 0.000000e+00 : f32
    %88 = vector.broadcast %cst_22 : f32 to vector<8x128xf32>
    %89 = arith.maximumf %87, %88 : vector<8x128xf32>
    %c0_23 = arith.constant 0 : index
    %c0_24 = arith.constant 0 : index
    %90 = vector.load %arg10[%c0_23, %c0_24] : memref<128x64xf32, #tpu.memory_space<vmem>>, vector<128x64xf32>
    %cst_25 = arith.constant dense<0.000000e+00> : vector<8x64xf32>
    %91 = tpu.matmul %89, %90, %cst_25 {dimension_numbers = #tpu.dot_dimension_numbers<[1], [0], [0], [1], [0, 0, 1, 1], [], []>} : vector<8x128xf32>, vector<128x64xf32>, vector<8x64xf32> -> vector<8x64xf32>
    %c0_26 = arith.constant 0 : index
    %c0_27 = arith.constant 0 : index
    %92 = vector.load %arg11[%c0_26, %c0_27] : memref<1x64xf32, #tpu.memory_space<vmem>>, vector<1x64xf32>
    %93 = vector.broadcast %92 : vector<1x64xf32> to vector<8x64xf32>
    %94 = arith.addf %91, %93 : vector<8x64xf32>
    %cst_28 = arith.constant 0.000000e+00 : f32
    %95 = vector.broadcast %cst_28 : f32 to vector<8x64xf32>
    %96 = arith.maximumf %94, %95 : vector<8x64xf32>
    %c0_29 = arith.constant 0 : index
    %c0_30 = arith.constant 0 : index
    %97 = vector.load %arg12[%c0_29, %c0_30] : memref<64x128xf32, #tpu.memory_space<vmem>>, vector<64x128xf32>
    %cst_31 = arith.constant dense<0.000000e+00> : vector<8x128xf32>
    %98 = tpu.matmul %96, %97, %cst_31 {dimension_numbers = #tpu.dot_dimension_numbers<[1], [0], [0], [1], [0, 0, 1, 1], [], []>} : vector<8x64xf32>, vector<64x128xf32>, vector<8x128xf32> -> vector<8x128xf32>
    %c0_32 = arith.constant 0 : index
    %c0_33 = arith.constant 0 : index
    %99 = vector.load %arg13[%c0_32, %c0_33] : memref<1x128xf32, #tpu.memory_space<vmem>>, vector<1x128xf32>
    %100 = vector.broadcast %99 : vector<1x128xf32> to vector<8x128xf32>
    %101 = arith.addf %98, %100 : vector<8x128xf32>
    %c0_34 = arith.constant 0 : index
    %c0_35 = arith.constant 0 : index
    %102 = vector.load %arg14[%c0_34, %c0_35] : memref<8x128xf32, #tpu.memory_space<vmem>>, vector<8x128xf32>
    tpu.vector_store %arg14[%c0_34, %c0_35], %101 {strides = array<i32>} : memref<8x128xf32, #tpu.memory_space<vmem>>, vector<8x128xf32>,
    return
  }
  func.func @transform_0(%arg0: i32) -> (i32, i32, i32) {
    %c0_i32 = arith.constant 0 : i32
    %c0_i32_0 = arith.constant 0 : i32
    %c0_i32_1 = arith.constant 0 : i32
    return %arg0, %c0_i32, %c0_i32_0 : i32, i32, i32
  }
  func.func @transform_1(%arg0: i32) -> (i32, i32) {
    %c0_i32 = arith.constant 0 : i32
    %c0_i32_0 = arith.constant 0 : i32
    return %arg0, %c0_i32 : i32, i32
  }
  func.func @transform_2(%arg0: i32) -> (i32, i32) {
    %c0_i32 = arith.constant 0 : i32
    %c0_i32_0 = arith.constant 0 : i32
    %c0_i32_1 = arith.constant 0 : i32
    return %c0_i32, %c0_i32_0 : i32, i32
  }
  func.func @transform_3(%arg0: i32) -> (i32, i32) {
    %c0_i32 = arith.constant 0 : i32
    %c0_i32_0 = arith.constant 0 : i32
    %c0_i32_1 = arith.constant 0 : i32
    return %c0_i32, %c0_i32_0 : i32, i32
  }
  func.func @transform_4(%arg0: i32) -> (i32, i32) {
    %c0_i32 = arith.constant 0 : i32
    %c0_i32_0 = arith.constant 0 : i32
    %c0_i32_1 = arith.constant 0 : i32
    return %c0_i32, %c0_i32_0 : i32, i32
  }
  func.func @transform_5(%arg0: i32) -> (i32, i32) {
    %c0_i32 = arith.constant 0 : i32
    %c0_i32_0 = arith.constant 0 : i32
    %c0_i32_1 = arith.constant 0 : i32
    return %c0_i32, %c0_i32_0 : i32, i32
  }
  func.func @transform_6(%arg0: i32) -> (i32, i32) {
    %c0_i32 = arith.constant 0 : i32
    %c0_i32_0 = arith.constant 0 : i32
    %c0_i32_1 = arith.constant 0 : i32
    return %c0_i32, %c0_i32_0 : i32, i32
  }
  func.func @transform_7(%arg0: i32) -> (i32, i32) {
    %c0_i32 = arith.constant 0 : i32
    %c0_i32_0 = arith.constant 0 : i32
    %c0_i32_1 = arith.constant 0 : i32
    return %c0_i32, %c0_i32_0 : i32, i32
  }
  func.func @transform_8(%arg0: i32) -> (i32, i32) {
    %c0_i32 = arith.constant 0 : i32
    %c0_i32_0 = arith.constant 0 : i32
    %c0_i32_1 = arith.constant 0 : i32
    return %c0_i32, %c0_i32_0 : i32, i32
  }
  func.func @transform_9(%arg0: i32) -> (i32, i32) {
    %c0_i32 = arith.constant 0 : i32
    %c0_i32_0 = arith.constant 0 : i32
    %c0_i32_1 = arith.constant 0 : i32
    return %c0_i32, %c0_i32_0 : i32, i32
  }
  func.func @transform_10(%arg0: i32) -> (i32, i32) {
    %c0_i32 = arith.constant 0 : i32
    %c0_i32_0 = arith.constant 0 : i32
    %c0_i32_1 = arith.constant 0 : i32
    return %c0_i32, %c0_i32_0 : i32, i32
  }
  func.func @transform_11(%arg0: i32) -> (i32, i32) {
    %c0_i32 = arith.constant 0 : i32
    %c0_i32_0 = arith.constant 0 : i32
    %c0_i32_1 = arith.constant 0 : i32
    return %c0_i32, %c0_i32_0 : i32, i32
  }
  func.func @transform_12(%arg0: i32) -> (i32, i32) {
    %c0_i32 = arith.constant 0 : i32
    %c0_i32_0 = arith.constant 0 : i32
    %c0_i32_1 = arith.constant 0 : i32
    return %c0_i32, %c0_i32_0 : i32, i32
  }
  func.func @transform_13(%arg0: i32) -> (i32, i32) {
    %c0_i32 = arith.constant 0 : i32
    %c0_i32_0 = arith.constant 0 : i32
    return %arg0, %c0_i32 : i32, i32
  }
}

</mosaic_0001>

<bundles_post_ra>
// kernel: tpu_custom_call.1
= control target key start
LH: loop header
LB: loop body
LE: loop exit
PB: predicated region body
PF: predicated region fallthrough
CT: control target
= control target key end

     0   :  { %18 = vsyncpa [#allocation3], 0  ;;  %s2395_s0 = inlined_call_operand.vmem [shape: bf16[1,288,16], index: 0, kind: input, shape index: {}]   ;;  %s2396_s1 = inlined_call_operand.vmem [shape: f32[8,24], index: 1, kind: input, shape index: {}]   ;;  %s2397_s2 = inlined_call_operand.vmem [shape: bf16[16,128], index: 2, kind: input, shape index: {}]   ;;  %s2398_s3 = inlined_call_operand.vmem [shape: f32[1,128], index: 3, kind: input, shape index: {}]   ;;  %s2399_s4 = inlined_call_operand.vmem [shape: bf16[128,64], index: 4, kind: input, shape index: {}]   ;;  %s2400_s5 = inlined_call_operand.vmem [shape: f32[1,64], index: 5, kind: input, shape index: {}]   ;;  %s2401_s6 = inlined_call_operand.hbm [shape: f32[576,128], index: 6, kind: input, shape index: {}]   ;;  %s2402_s7 = inlined_call_operand.vmem [shape: f32[24,128], index: 7, kind: input, shape index: {}]   ;;  %s2403_s8 = inlined_call_operand.vmem [shape: f32[1,128], index: 8, kind: input, shape index: {}]   ;;  %s2404_s9 = inlined_call_operand.vmem [shape: f32[128,64], index: 9, kind: input, shape index: {}]   ;;  %s2405_s10 = inlined_call_operand.vmem [shape: f32[1,64], index: 10, kind: input, shape index: {}]   ;;  %s2406_s11 = inlined_call_operand.vmem [shape: f32[64,128], index: 11, kind: input, shape index: {}]   ;;  %s2407_s12 = inlined_call_operand.vmem [shape: f32[1,128], index: 12, kind: input, shape index: {}]   ;;  %s2408_s13 = inlined_call_operand.hbm [shape: f32[8,128], index: 13, kind: output, shape index: {}]  }
   0x1   :  { %19 = vsyncpa [#allocation4], 0  ;;  %s1940_s25 = smov [#allocation2]   ;;  %s1892_s29 = scalar_lea.hbm %s2401_s6, 9216 }
   0x2   :  { %s37_s26 = sshll.u32 %s1940_s25, 4  ;;  %p1893_p0 = scmp.ne.s32.totalorder %s2401_s6, %s1892_s29  ;;  %s38_s26 = int_to_ptr.vmem [resolvable:$true] %s37_s26 }
   0x3   :  { %p1896_p1 = scmp.lt.u32.totalorder %s1892_s29, %s2401_s6 }
   0x5   :  { %p1898_p2 = pnand %p1896_p1, %p1893_p0 }
   0x7   :  { %1901 = shalt.err (!%p1898_p2)
}
   0x8   :  { %s1902_s17 = scalar_lea.vmem %s38_s26, 9216  ;;  %p1907_p4 = scmp.lt.s32.totalorder %s38_s26, %s38_s26 }
   0x9   :  { %p1903_p3 = scmp.ne.s32.totalorder %s38_s26, %s1902_s17  ;;  %p1908_p5 = scmp.lt.s32.totalorder %s1902_s17, %s1902_s17 }
   0xb   :  { %p1909_p6 = por %p1908_p5, %p1907_p4 }
   0xd   :  { %p1910_p7 = pnand %p1909_p6, %p1903_p3 }
   0xf   :  { %1913 = shalt.err (!%p1910_p7)
}
  0x10   :  { %s1941_s18 = smov 128   ;;  %s1942_s19 = smov 8  }
  0x11   :  { %43 = dma.hbm_to_vmem [thread:$0]  %s2401_s6, 9216, %s38_s26, [#allocation3], %s1941_s18, %s1941_s18, %s1942_s19  }
  0x12   :  { %1936 = dma.done.wait [#allocation3], 9216  }
  0x13   :  { %1937 = vsyncadd [#allocation3], 4294958080  ;;  %v1865_v0 = vld [vmem:[%s2397_s2] sm:$0xff]   ;;  %vm201_vm0 = vcmask 130048   ;;  %v1867_v2 = vld [vmem:[%s2395_s0 + $0x8] sm:$0xff]   ;;  %vm1945_vm1 = vmmov 0  }
  0x14   :  { %v1866_v1 = vld [vmem:[%s2395_s0] sm:$0xff]   ;;  %1560 = vmatprep.subr.bf16.mxu0 %v1865_v0  ;;  %v1868_v3 = vld [vmem:[%s2395_s0 + $0x10] sm:$0xff]   ;;  %v1869_v4 = vld [vmem:[%s2395_s0 + $0x18] sm:$0xff]   ;;  %vm859_vm2 = vcmask 195584   ;;  %vm778_vm3 = vcmask 523264   ;;  %s1947_s6 = smov [#allocation5]  }
  0x15   :  { %1561 = vmatpush3.bf16.msra.mxu0 %v1865_v0  ;;  %1562 = vmatprep.mubr.msk.bf16.mxu0 %vm201_vm0, %v1866_v1  ;;  %v1870_v5 = vld [vmem:[%s2395_s0 + $0x20] sm:$0xff]   ;;  %v1871_v6 = vld [vmem:[%s2395_s0 + $0x28] sm:$0xff]   ;;  %v1872_v7 = vld [vmem:[%s2395_s0 + $0x30] sm:$0xff]   ;;  %s1344_s26 = sshll.u32 %s1947_s6, 4  ;;  %s1345_s26 = int_to_ptr.vmem [resolvable:$true] %s1344_s26 }
  0x16   :  { %v1884_v8 = vld [vmem:[%s2399_s4] sm:$0xff]   ;;  %v1885_v9 = vld [vmem:[%s2399_s4 + $0x8] sm:$0xff]   ;;  %v1886_v10 = vld [vmem:[%s2399_s4 + $0x10] sm:$0xff]   ;;  %p1919_p9 = scmp.lt.s32.totalorder %s1345_s26, %s1345_s26 }
  0x17   :  { %1598 = vmatprep.subr.bf16.mxu1 %v1884_v8  ;;  %v1873_v11 = vld [vmem:[%s2395_s0 + $0x38] sm:$0xff]   ;;  %v1874_v12 = vld [vmem:[%s2395_s0 + $0x40] sm:$0xff]   ;;  %v1875_v15 = vld [vmem:[%s2395_s0 + $0x48] sm:$0xff]  }
  0x18   :  { %1563 = vmatmul.mubr.msk.bf16.vlgmr.msra.gmra.mrb[0].mxu0 %vm201_vm0, %v1867_v2  ;;  %1599 = vmatpush3.bf16.msra.mxu1 %v1884_v8  ;;  %v1887_v13 = vld [vmem:[%s2399_s4 + $0x18] sm:$0xff]   ;;  %v1888_v14 = vld [vmem:[%s2399_s4 + $0x20] sm:$0xff]   ;;  %v1876_v16 = vld [vmem:[%s2395_s0 + $0x50] sm:$0xff]  }
  0x19   :  { %1566 = vmatprep.mubr.msk.bf16.mxu0 %vm201_vm0, %v1868_v3  ;;  %1600 = vmatprep.subr.bf16.mxu1 %v1885_v9  ;;  %v1889_v17 = vld [vmem:[%s2399_s4 + $0x28] sm:$0xff]   ;;  %v1877_v18 = vld [vmem:[%s2395_s0 + $0x58] sm:$0xff]   ;;  %v1878_v19 = vld [vmem:[%s2395_s0 + $0x60] sm:$0xff]  }
  0x1a   :  { %v1879_v20 = vld [vmem:[%s2395_s0 + $0x68] sm:$0xff]   ;;  %v1880_v21 = vld [vmem:[%s2395_s0 + $0x70] sm:$0xff]   ;;  %v1881_v22 = vld [vmem:[%s2395_s0 + $0x78] sm:$0xff]  }
  0x1b   :  { %v1882_v23 = vld [vmem:[%s2395_s0 + $0x80] sm:$0xff]   ;;  %v1883_v24 = vld [vmem:[%s2395_s0 + $0x88] sm:$0xff]   ;;  %v1890_v25 = vld [vmem:[%s2399_s4 + $0x30] sm:$0xff]  }
  0x1c   :  { %1601 = vmatpush3.bf16.msra.mxu1 %v1885_v9  ;;  %v1891_v26 = vld [vmem:[%s2399_s4 + $0x38] sm:$0xff]   ;;  %v2132_v27 = vld [vmem:[%s2398_s3] ss:$0 sm:$0xff] }
  0x1d   :  { %1602 = vmatprep.subr.bf16.mxu1 %v1886_v10 }
  0x20   :  { %1567 = vmatmul.mubr.msk.bf16.gmra.mrb[4].mxu0 %vm201_vm0, %v1869_v4  ;;  %1603 = vmatpush3.bf16.msra.mxu1 %v1886_v10 }
  0x21   :  { %1570 = vmatprep.mubr.msk.bf16.mxu0 %vm201_vm0, %v1870_v5  ;;  %1604 = vmatprep.subr.bf16.mxu1 %v1887_v13 }
  0x24   :  { %1605 = vmatpush3.bf16.msra.mxu1 %v1887_v13 }
  0x25   :  { %1606 = vmatprep.subr.bf16.mxu1 %v1888_v14 }
  0x28   :  { %1571 = vmatmul.mubr.msk.bf16.gmra.mrb[8].mxu0 %vm201_vm0, %v1871_v6  ;;  %1607 = vmatpush3.bf16.msra.mxu1 %v1888_v14 }
  0x29   :  { %1574 = vmatprep.mubr.msk.bf16.mxu0 %vm201_vm0, %v1872_v7  ;;  %1608 = vmatprep.subr.bf16.mxu1 %v1889_v17 }
  0x2c   :  { %1609 = vmatpush3.bf16.msra.mxu1 %v1889_v17 }
  0x2d   :  { %1610 = vmatprep.subr.bf16.mxu1 %v1890_v25 }
  0x30   :  { %1575 = vmatmul.mubr.msk.bf16.gmra.mrb[12].mxu0 %vm201_vm0, %v1873_v11  ;;  %1611 = vmatpush3.bf16.msra.mxu1 %v1890_v25 }
  0x31   :  { %1578 = vmatprep.mubr.msk.bf16.mxu0 %vm201_vm0, %v1874_v12  ;;  %1612 = vmatprep.subr.bf16.mxu1 %v1891_v26 }
  0x34   :  { %1613 = vmatpush3.bf16.msra.mxu1 %v1891_v26 }
  0x38   :  { %1579 = vmatmul.mubr.msk.bf16.gmra.mrb[16].mxu0 %vm201_vm0, %v1875_v15 }
  0x39   :  { %1582 = vmatprep.mubr.msk.bf16.mxu0 %vm201_vm0, %v1876_v16 }
  0x40   :  { %1583 = vmatmul.mubr.msk.bf16.gmra.mrb[20].mxu0 %vm201_vm0, %v1877_v18 }
  0x41   :  { %1586 = vmatprep.mubr.msk.bf16.mxu0 %vm201_vm0, %v1878_v19 }
  0x48   :  { %1587 = vmatmul.mubr.msk.bf16.gmra.mrb[24].mxu0 %vm201_vm0, %v1879_v20 }
  0x49   :  { %1590 = vmatprep.mubr.msk.bf16.mxu0 %vm201_vm0, %v1880_v21 }
  0x50   :  { %1591 = vmatmul.mubr.msk.bf16.gmra.mrb[28].mxu0 %vm201_vm0, %v1881_v22 }
  0x51   :  { %1594 = vmatprep.mubr.msk.bf16.mxu0 %vm201_vm0, %v1882_v23 }
  0x58   :  { %1595 = vmatmul.mubr.msk.bf16.gmra.mrb[32].mxu0 %vm201_vm0, %v1883_v24 }
  0xeb   :  { %v1564_v28 = vpop.f32.mrb[0].mxu0 }
  0xec   :  { %v299_v29 = vadd.f32 %v1564_v28, %v2132_v27  ;;  %v290_v30 = vpop.f32.mrb[1].mxu0 }
  0xed   :  { %v291_v31 = vadd.f32 %v2132_v27, %v290_v30  ;;  %v1565_v32 = vpop.f32.mrb[2].mxu0 }
  0xee   :  { %v302_v33 = vadd.f32 %v1565_v32, %v2132_v27  ;;  %v293_v34 = vpop.f32.mrb[3].mxu0  ;;  %v435_v36 = vmax.f32 %v299_v29, 0.0 }
  0xef   :  { %v294_v35 = vadd.f32 %v2132_v27, %v293_v34  ;;  %v433_v38 = vmax.f32 %v291_v31, 0.0 }
  0xf0   :  { %v436_v37 = vmax.f32 %v302_v33, 0.0 }
  0xf1   :  { %v434_v39 = vmax.f32 %v294_v35, 0.0 }
  0xf2   :  { %v470_v40 = vpack.c.bf16 %v436_v37, %v435_v36 }
  0xf3   :  { %v1568_v41 = vpop.f32.mrb[4].mxu0  ;;  %v469_v42 = vpack.c.bf16 %v434_v39, %v433_v38 }
  0xf4   :  { %v315_v43 = vadd.f32 %v1568_v41, %v2132_v27  ;;  %v306_v44 = vpop.f32.mrb[5].mxu0 }
  0xf5   :  { %v307_v45 = vadd.f32 %v2132_v27, %v306_v44  ;;  %v1569_v46 = vpop.f32.mrb[6].mxu0  ;;  %1614 = vmatprep.mubr.bf16.mxu1 %v469_v42 }
  0xf6   :  { %v318_v47 = vadd.f32 %v1569_v46, %v2132_v27  ;;  %v309_v48 = vpop.f32.mrb[7].mxu0  ;;  %1615 = vmatmul.mubr.bf16.vlgmr.msra.gmra.mrb[0].mxu1 %v470_v40  ;;  %v439_v50 = vmax.f32 %v315_v43, 0.0 }
  0xf7   :  { %v310_v49 = vadd.f32 %v2132_v27, %v309_v48  ;;  %v437_v52 = vmax.f32 %v307_v45, 0.0 }
  0xf8   :  { %v440_v51 = vmax.f32 %v318_v47, 0.0 }
  0xf9   :  { %v438_v53 = vmax.f32 %v310_v49, 0.0 }
  0xfa   :  { %v472_v54 = vpack.c.bf16 %v440_v51, %v439_v50 }
  0xfb   :  { %v471_v55 = vpack.c.bf16 %v438_v53, %v437_v52  ;;  %v1572_v56 = vpop.f32.mrb[8].mxu0 }
  0xfc   :  { %v331_v57 = vadd.f32 %v1572_v56, %v2132_v27  ;;  %v322_v58 = vpop.f32.mrb[9].mxu0 }
  0xfd   :  { %v323_v59 = vadd.f32 %v2132_v27, %v322_v58  ;;  %v1573_v60 = vpop.f32.mrb[10].mxu0  ;;  %1618 = vmatprep.mubr.bf16.mxu1 %v471_v55 }
  0xfe   :  { %v334_v61 = vadd.f32 %v1573_v60, %v2132_v27  ;;  %v325_v62 = vpop.f32.mrb[11].mxu0  ;;  %1619 = vmatmul.mubr.bf16.gmra.mrb[4].mxu1 %v472_v54  ;;  %v443_v0 = vmax.f32 %v331_v57, 0.0 }
  0xff   :  { %v326_v63 = vadd.f32 %v2132_v27, %v325_v62  ;;  %v441_v2 = vmax.f32 %v323_v59, 0.0 }
 0x100   :  { %v444_v1 = vmax.f32 %v334_v61, 0.0 }
 0x101   :  { %v442_v3 = vmax.f32 %v326_v63, 0.0 }
 0x102   :  { %v474_v4 = vpack.c.bf16 %v444_v1, %v443_v0 }
 0x103   :  { %v473_v5 = vpack.c.bf16 %v442_v3, %v441_v2  ;;  %v1576_v6 = vpop.f32.mrb[12].mxu0 }
 0x104   :  { %v347_v7 = vadd.f32 %v1576_v6, %v2132_v27  ;;  %v338_v8 = vpop.f32.mrb[13].mxu0 }
 0x105   :  { %v339_v9 = vadd.f32 %v2132_v27, %v338_v8  ;;  %v1577_v10 = vpop.f32.mrb[14].mxu0  ;;  %1622 = vmatprep.mubr.bf16.mxu1 %v473_v5 }
 0x106   :  { %v350_v11 = vadd.f32 %v1577_v10, %v2132_v27  ;;  %v341_v12 = vpop.f32.mrb[15].mxu0  ;;  %1623 = vmatmul.mubr.bf16.gmra.mrb[8].mxu1 %v474_v4  ;;  %v447_v14 = vmax.f32 %v347_v7, 0.0 }
 0x107   :  { %v342_v13 = vadd.f32 %v2132_v27, %v341_v12  ;;  %v445_v16 = vmax.f32 %v339_v9, 0.0 }
 0x108   :  { %v448_v15 = vmax.f32 %v350_v11, 0.0 }
 0x109   :  { %v446_v17 = vmax.f32 %v342_v13, 0.0 }
 0x10a   :  { %v476_v18 = vpack.c.bf16 %v448_v15, %v447_v14 }
 0x10b   :  { %v475_v19 = vpack.c.bf16 %v446_v17, %v445_v16  ;;  %v1580_v20 = vpop.f32.mrb[16].mxu0 }
 0x10c   :  { %v363_v21 = vadd.f32 %v1580_v20, %v2132_v27  ;;  %v354_v22 = vpop.f32.mrb[17].mxu0 }
 0x10d   :  { %v355_v23 = vadd.f32 %v2132_v27, %v354_v22  ;;  %v1581_v24 = vpop.f32.mrb[18].mxu0  ;;  %1626 = vmatprep.mubr.bf16.mxu1 %v475_v19 }
 0x10e   :  { %v366_v25 = vadd.f32 %v1581_v24, %v2132_v27  ;;  %v357_v26 = vpop.f32.mrb[19].mxu0  ;;  %1627 = vmatmul.mubr.bf16.gmra.mrb[12].mxu1 %v476_v18  ;;  %v451_v29 = vmax.f32 %v363_v21, 0.0 }
 0x10f   :  { %v358_v28 = vadd.f32 %v2132_v27, %v357_v26  ;;  %v449_v31 = vmax.f32 %v355_v23, 0.0 }
 0x110   :  { %v452_v30 = vmax.f32 %v366_v25, 0.0 }
 0x111   :  { %v450_v32 = vmax.f32 %v358_v28, 0.0  ;;  %v856_v28 = vld [vmem:[%s2402_s7] sm:$0xff] }
 0x112   :  { %v478_v33 = vpack.c.bf16 %v452_v30, %v451_v29  ;;  %v857_v29 = vld [vmem:[%s2402_s7 + $0x8] sm:$0xff]  ;;  %v799_v30 = vld [vmem:[#allocation2 + $0x80] sm:$0xff] }
 0x113   :  { %v477_v34 = vpack.c.bf16 %v450_v32, %v449_v31  ;;  %v1584_v35 = vpop.f32.mrb[20].mxu0  ;;  %v1943_v31 = vmov 0.0|0.0   ;;  %v800_v32 = vld [vmem:[#allocation2 + $0x88] sm:$0xff] }
 0x114   :  { %v379_v36 = vadd.f32 %v1584_v35, %v2132_v27  ;;  %v370_v37 = vpop.f32.mrb[21].mxu0  ;;  %1732 = vmatprep.subr.bf16.mxu0 %v1943_v31  ;;  %v1735_v35 = vpack.c.bf16 %v800_v32, %v799_v30 }
 0x115   :  { %v371_v38 = vadd.f32 %v2132_v27, %v370_v37  ;;  %v1585_v39 = vpop.f32.mrb[22].mxu0  ;;  %1630 = vmatprep.mubr.bf16.mxu1 %v477_v34  ;;  %v784_v34 = vld [vmem:[#allocation2 + $0x8] sm:$0xff]  ;;  %v801_v37 = vld [vmem:[#allocation2 + $0x90] sm:$0xff] }
 0x116   :  { %v382_v40 = vadd.f32 %v1585_v39, %v2132_v27  ;;  %v373_v41 = vpop.f32.mrb[23].mxu0  ;;  %1631 = vmatmul.mubr.bf16.gmra.mrb[16].mxu1 %v478_v33  ;;  %v455_v43 = vmax.f32 %v379_v36, 0.0  ;;  %v783_v33 = vld [vmem:[#allocation2] sm:$0xff]  ;;  %v785_v39 = vld [vmem:[#allocation2 + $0x10] sm:$0xff]  ;;  %1736 = vmatprep.subr.bf16.mxu1 %v1735_v35 }
 0x117   :  { %v374_v42 = vadd.f32 %v2132_v27, %v373_v41  ;;  %v453_v45 = vmax.f32 %v371_v38, 0.0  ;;  %v1737_v36 = vpack.c.bf16 %v784_v34, %v783_v33  ;;  %v802_v38 = vld [vmem:[#allocation2 + $0x98] sm:$0xff] }
 0x118   :  { %v456_v44 = vmax.f32 %v382_v40, 0.0  ;;  %v1739_v40 = vpack.c.bf16 %v802_v38, %v801_v37  ;;  %v786_v41 = vld [vmem:[#allocation2 + $0x18] sm:$0xff] }
 0x119   :  { %v454_v46 = vmax.f32 %v374_v42, 0.0  ;;  %v803_v42 = vld [vmem:[#allocation2 + $0xa0] sm:$0xff]  ;;  %1738 = vmatpush3.bf16.msra.mxu1 %v1737_v36 }
 0x11a   :  { %v480_v47 = vpack.c.bf16 %v456_v44, %v455_v43  ;;  %v1944_v43 = vmov 0.0   ;;  %v858_v44 = vld [vmem:[%s2402_s7 + $0x10] sm:$0xff]  ;;  %1740 = vmatprep.subr.bf16.mxu1 %v1739_v40 }
 0x11b   :  { %v479_v48 = vpack.c.bf16 %v454_v46, %v453_v45  ;;  %v1588_v49 = vpop.f32.mrb[24].mxu0  ;;  %v804_v45 = vld [vmem:[#allocation2 + $0xa8] sm:$0xff]  ;;  %v1741_v46 = vpack.c.bf16 %v786_v41, %v785_v39  ;;  %1656 = vmatprep.mubr.msk.f32.mxu0 %vm1945_vm1, %v1944_v43 }
 0x11c   :  { %v395_v50 = vadd.f32 %v1588_v49, %v2132_v27  ;;  %v386_v51 = vpop.f32.mrb[25].mxu0  ;;  %v788_v49 = vld [vmem:[#allocation2 + $0x28] sm:$0xff] }
 0x11d   :  { %v387_v52 = vadd.f32 %v2132_v27, %v386_v51  ;;  %v1589_v53 = vpop.f32.mrb[26].mxu0  ;;  %1634 = vmatprep.mubr.bf16.mxu1 %v479_v48  ;;  %v787_v48 = vld [vmem:[#allocation2 + $0x20] sm:$0xff]  ;;  %v806_v51 = vld [vmem:[#allocation2 + $0xb8] sm:$0xff]  ;;  %1742 = vmatpush3.bf16.msra.mxu1 %v1741_v46 }
 0x11e   :  { %v398_v54 = vadd.f32 %v1589_v53, %v2132_v27  ;;  %v389_v55 = vpop.f32.mrb[27].mxu0  ;;  %1635 = vmatmul.mubr.bf16.gmra.mrb[20].mxu1 %v480_v47  ;;  %v459_v57 = vmax.f32 %v395_v50, 0.0  ;;  %v1743_v47 = vpack.c.bf16 %v804_v45, %v803_v42  ;;  %v805_v50 = vld [vmem:[#allocation2 + $0xb0] sm:$0xff] }
 0x11f   :  { %v390_v56 = vadd.f32 %v2132_v27, %v389_v55  ;;  %v457_v59 = vmax.f32 %v387_v52, 0.0  ;;  %v1745_v52 = vpack.c.bf16 %v788_v49, %v787_v48  ;;  %v1747_v53 = vpack.c.bf16 %v806_v51, %v805_v50  ;;  %v790_v55 = vld [vmem:[#allocation2 + $0x38] sm:$0xff] }
 0x120   :  { %v460_v58 = vmax.f32 %v398_v54, 0.0  ;;  %1744 = vmatprep.subr.bf16.mxu1 %v1743_v47  ;;  %v789_v54 = vld [vmem:[#allocation2 + $0x30] sm:$0xff] }
 0x121   :  { %v458_v60 = vmax.f32 %v390_v56, 0.0  ;;  %v807_v56 = vld [vmem:[#allocation2 + $0xc0] sm:$0xff]  ;;  %1746 = vmatpush3.bf16.msra.mxu1 %v1745_v52  ;;  %v797_v52 = vld [vmem:[#allocation2 + $0x70] sm:$0xff] }
 0x122   :  { %v482_v61 = vpack.c.bf16 %v460_v58, %v459_v57  ;;  %v808_v57 = vld [vmem:[#allocation2 + $0xc8] sm:$0xff]  ;;  %v1749_v58 = vpack.c.bf16 %v790_v55, %v789_v54  ;;  %1748 = vmatprep.subr.bf16.mxu1 %v1747_v53  ;;  %v798_v53 = vld [vmem:[#allocation2 + $0x78] sm:$0xff] }
 0x123   :  { %v481_v62 = vpack.c.bf16 %v458_v60, %v457_v59  ;;  %v1592_v63 = vpop.f32.mrb[28].mxu0  ;;  %v1751_v59 = vpack.c.bf16 %v808_v57, %v807_v56  ;;  %v791_v60 = vld [vmem:[#allocation2 + $0x40] sm:$0xff]  ;;  %v1765_v55 = vpack.c.bf16 %v798_v53, %v797_v52  ;;  %v821_v52 = vld [vmem:[#allocation2 + $0x130] sm:$0xff]  ;;  %v822_v53 = vld [vmem:[#allocation2 + $0x138] sm:$0xff] }
 0x124   :  { %v411_v0 = vadd.f32 %v1592_v63, %v2132_v27  ;;  %v402_v1 = vpop.f32.mrb[29].mxu0  ;;  %v810_v63 = vld [vmem:[#allocation2 + $0xd8] sm:$0xff] }
 0x125   :  { %v403_v2 = vadd.f32 %v2132_v27, %v402_v1  ;;  %v1593_v3 = vpop.f32.mrb[30].mxu0  ;;  %1638 = vmatprep.mubr.bf16.mxu1 %v481_v62  ;;  %v809_v62 = vld [vmem:[#allocation2 + $0xd0] sm:$0xff]  ;;  %1750 = vmatpush3.bf16.msra.mxu1 %v1749_v58 }
 0x126   :  { %v414_v4 = vadd.f32 %v1593_v3, %v2132_v27  ;;  %v405_v5 = vpop.f32.mrb[31].mxu0  ;;  %1639 = vmatmul.mubr.bf16.gmra.mrb[24].mxu1 %v482_v61  ;;  %v463_v7 = vmax.f32 %v411_v0, 0.0  ;;  %v792_v61 = vld [vmem:[#allocation2 + $0x48] sm:$0xff]  ;;  %1752 = vmatprep.subr.bf16.mxu1 %v1751_v59  ;;  %v1755_v1 = vpack.c.bf16 %v810_v63, %v809_v62  ;;  %v794_v3 = vld [vmem:[#allocation2 + $0x58] sm:$0xff]  ;;  %v831_v63 = vld [vmem:[#allocation2 + $0x180] sm:$0xff] }
 0x127   :  { %v406_v6 = vadd.f32 %v2132_v27, %v405_v5  ;;  %v461_v9 = vmax.f32 %v403_v2, 0.0  ;;  %v1753_v0 = vpack.c.bf16 %v792_v61, %v791_v60  ;;  %v793_v2 = vld [vmem:[#allocation2 + $0x50] sm:$0xff]  ;;  %v812_v5 = vld [vmem:[#allocation2 + $0xe8] sm:$0xff] }
 0x128   :  { %v464_v8 = vmax.f32 %v414_v4, 0.0  ;;  %v811_v4 = vld [vmem:[#allocation2 + $0xe0] sm:$0xff] }
 0x129   :  { %v462_v10 = vmax.f32 %v406_v6, 0.0  ;;  %1754 = vmatpush3.bf16.msra.mxu1 %v1753_v0  ;;  %v1757_v6 = vpack.c.bf16 %v794_v3, %v793_v2  ;;  %v832_v0 = vld [vmem:[#allocation2 + $0x188] sm:$0xff]  ;;  %v815_v3 = vld [vmem:[#allocation2 + $0x100] sm:$0xff] }
 0x12a   :  { %v484_v11 = vpack.c.bf16 %v464_v8, %v463_v7  ;;  %1756 = vmatprep.subr.bf16.mxu1 %v1755_v1  ;;  %v1759_v7 = vpack.c.bf16 %v812_v5, %v811_v4  ;;  %v795_v8 = vld [vmem:[#allocation2 + $0x60] sm:$0xff]  ;;  %v1767_v2 = vpack.c.bf16 %v832_v0, %v831_v63  ;;  %v816_v4 = vld [vmem:[#allocation2 + $0x108] sm:$0xff]  ;;  %v841_v63 = vld [vmem:[#allocation2 + $0x1d0] sm:$0xff] }
 0x12b   :  { %v483_v12 = vpack.c.bf16 %v462_v10, %v461_v9  ;;  %v1596_v13 = vpop.f32.mrb[32].mxu0  ;;  %v796_v9 = vld [vmem:[#allocation2 + $0x68] sm:$0xff]  ;;  %v813_v10 = vld [vmem:[#allocation2 + $0xf0] sm:$0xff] }
 0x12c   :  { %v427_v14 = vadd.f32 %v1596_v13, %v2132_v27  ;;  %v418_v15 = vpop.f32.mrb[33].mxu0 }
 0x12d   :  { %v419_v16 = vadd.f32 %v2132_v27, %v418_v15  ;;  %v1597_v17 = vpop.f32.mrb[34].mxu0  ;;  %1642 = vmatprep.mubr.bf16.mxu1 %v483_v12  ;;  %1758 = vmatpush3.bf16.msra.mxu1 %v1757_v6  ;;  %v1761_v12 = vpack.c.bf16 %v796_v9, %v795_v8  ;;  %v2184_v15 = vld [vmem:[%s2400_s5] ss:$0 sm:$0xff]  ;;  %v1769_v8 = vpack.c.bf16 %v816_v4, %v815_v3  ;;  %v825_v3 = vld [vmem:[#allocation2 + $0x150] sm:$0xff]  ;;  %v826_v4 = vld [vmem:[#allocation2 + $0x158] sm:$0xff] }
 0x12e   :  { %v430_v18 = vadd.f32 %v1597_v17, %v2132_v27  ;;  %v421_v19 = vpop.f32.mrb[35].mxu0  ;;  %1643 = vmatmul.mubr.bf16.gmra.mrb[28].mxu1 %v484_v11  ;;  %v467_v21 = vmax.f32 %v427_v14, 0.0  ;;  %v814_v11 = vld [vmem:[#allocation2 + $0xf8] sm:$0xff]  ;;  %1760 = vmatprep.subr.bf16.mxu1 %v1759_v7  ;;  %v855_v7 = vld [vmem:[%s2396_s1] sm:$0xff]  ;;  %s1946_s1 = smov 64  }
 0x12f   :  { %v422_v20 = vadd.f32 %v2132_v27, %v421_v19  ;;  %v465_v23 = vmax.f32 %v419_v16, 0.0  ;;  %v1733_v27 = vpack.c.bf16 %v857_v29, %v856_v28  ;;  %v1763_v13 = vpack.c.bf16 %v814_v11, %v813_v10 }
 0x130   :  { %v468_v22 = vmax.f32 %v430_v18, 0.0 }
 0x131   :  { %v466_v24 = vmax.f32 %v422_v20, 0.0  ;;  %1734 = vmatpush3.bf16.msra.mxu0 %v1733_v27  ;;  %1762 = vmatpush3.bf16.msra.mxu1 %v1761_v12 }
 0x132   :  { %v486_v25 = vpack.c.bf16 %v468_v22, %v467_v21  ;;  %1654 = vmatprep.subr.mxu0 %v1944_v43  ;;  %1764 = vmatprep.subr.bf16.mxu1 %v1763_v13  ;;  %v833_v13 = vld [vmem:[#allocation2 + $0x190] sm:$0xff] }
 0x133   :  { %v485_v26 = vpack.c.bf16 %v466_v24, %v465_v23 }
 0x135   :  { %1646 = vmatprep.mubr.bf16.mxu1 %v485_v26  ;;  %1655 = vmatpush3.msra.mxu0 %v858_v44 }
 0x136   :  { %1647 = vmatmul.mubr.bf16.gmra.mrb[32].mxu1 %v486_v25  ;;  %1657 = vmatmul.mubr.msk.f32.vlgmr.msra.gmra.mrb[36].mxu0 %vm859_vm2, %v855_v7  ;;  %v843_v7 = vld [vmem:[#allocation2 + $0x1e0] sm:$0xff] }
 0x137   :  { %1766 = vmatpush3.bf16.msra.mxu1 %v1765_v55  ;;  %1768 = vmatprep.subr.bf16.mxu0 %v1767_v2  ;;  %v1781_v55 = vpack.c.bf16 %v822_v53, %v821_v52  ;;  %v842_v2 = vld [vmem:[#allocation2 + $0x1d8] sm:$0xff] }
 0x138   :  { %1799 = vmatprep.subr.bf16.mxu1 %v1943_v31  ;;  %1770 = vmatpush3.bf16.msra.mxu0 %v1769_v8  ;;  %v844_v8 = vld [vmem:[#allocation2 + $0x1e8] sm:$0xff] }
 0x1c9   :  { %v1616_v14 = vpop.f32.mrb[0].mxu1 }
 0x1ca   :  { %v592_v16 = vpop.f32.mrb[1].mxu1  ;;  %v601_v18 = vadd.f32 %v1616_v14, %v2184_v15  ;;  %v834_v14 = vld [vmem:[#allocation2 + $0x198] sm:$0xff] }
 0x1cb   :  { %v1617_v17 = vpop.f32.mrb[2].mxu1  ;;  %v593_v21 = vadd.f32 %v2184_v15, %v592_v16 }
 0x1cc   :  { %v604_v19 = vadd.f32 %v1617_v17, %v2184_v15  ;;  %v595_v20 = vpop.f32.mrb[3].mxu1 }
 0x1cd   :  { %v596_v22 = vadd.f32 %v2184_v15, %v595_v20  ;;  %v818_v20 = vld [vmem:[#allocation2 + $0x118] sm:$0xff] }
 0x1ce   :  { %v738_v23 = vmax.f32 %v601_v18, %v604_v19  ;;  %v1771_v18 = vpack.c.bf16 %v834_v14, %v833_v13  ;;  %v817_v19 = vld [vmem:[#allocation2 + $0x110] sm:$0xff] }
 0x1cf   :  { %v735_v24 = vmax.f32 %v593_v21, %v596_v22  ;;  %v1773_v22 = vpack.c.bf16 %v818_v20, %v817_v19 }
 0x1d0   :  { %1772 = vmatprep.subr.bf16.mxu0 %v1771_v18  ;;  %v828_v18 = vld [vmem:[#allocation2 + $0x168] sm:$0xff] }
 0x1d1   :  { %v1620_v25 = vpop.f32.mrb[4].mxu1  ;;  %1774 = vmatpush3.bf16.msra.mxu0 %v1773_v22 }
 0x1d2   :  { %v617_v26 = vadd.f32 %v1620_v25, %v2184_v15  ;;  %v608_v28 = vpop.f32.mrb[5].mxu1  ;;  %v835_v25 = vld [vmem:[#allocation2 + $0x1a0] sm:$0xff] }
 0x1d3   :  { %v1621_v29 = vpop.f32.mrb[6].mxu1  ;;  %v609_v33 = vadd.f32 %v2184_v15, %v608_v28 }
 0x1d4   :  { %v2191_v30 = vmax.f32 %v735_v24, %v617_v26  ;;  %v2194_v27 = vadd.f32 %v1621_v29, %v2184_v15  ;;  %v611_v32 = vpop.f32.mrb[7].mxu1  ;;  %v836_v26 = vld [vmem:[#allocation2 + $0x1a8] sm:$0xff] }
 0x1d5   :  { %v612_v34 = vadd.f32 %v2184_v15, %v611_v32  ;;  %v1775_v29 = vpack.c.bf16 %v836_v26, %v835_v25  ;;  %v819_v32 = vld [vmem:[#allocation2 + $0x120] sm:$0xff] }
 0x1d6   :  { %v737_v35 = vmax.f32 %v2191_v30, %v2194_v27  ;;  %v853_v30 = vld [vmem:[#allocation2 + $0x230] sm:$0xff]  ;;  %v854_v27 = vld [vmem:[#allocation2 + $0x238] sm:$0xff] }
 0x1d7   :  { %v741_v36 = vmax.f32 %v609_v33, %v612_v34  ;;  %v820_v33 = vld [vmem:[#allocation2 + $0x128] sm:$0xff]  ;;  %1776 = vmatprep.subr.bf16.mxu0 %v1775_v29 }
 0x1d9   :  { %v1624_v37 = vpop.f32.mrb[8].mxu1 }
 0x1da   :  { %v633_v38 = vadd.f32 %v1624_v37, %v2184_v15  ;;  %v624_v39 = vpop.f32.mrb[9].mxu1  ;;  %v1777_v37 = vpack.c.bf16 %v820_v33, %v819_v32  ;;  %v845_v32 = vld [vmem:[#allocation2 + $0x1f0] sm:$0xff]  ;;  %v846_v33 = vld [vmem:[#allocation2 + $0x1f8] sm:$0xff] }
 0x1db   :  { %v625_v40 = vadd.f32 %v2184_v15, %v624_v39  ;;  %v1625_v41 = vpop.f32.mrb[10].mxu1 }
 0x1dc   :  { %v2202_v42 = vmax.f32 %v741_v36, %v633_v38  ;;  %v2205_v44 = vadd.f32 %v1625_v41, %v2184_v15  ;;  %v627_v45 = vpop.f32.mrb[11].mxu1  ;;  %1778 = vmatpush3.bf16.msra.mxu0 %v1777_v37  ;;  %v1795_v37 = vpack.c.bf16 %v846_v33, %v845_v32  ;;  %v1166_v32 = vld [vmem:[%s2404_s9 + $0x58] sm:$0xff] }
 0x1dd   :  { %v739_v46 = vmax.f32 %v738_v23, %v625_v40  ;;  %v628_v47 = vadd.f32 %v2184_v15, %v627_v45 }
 0x1de   :  { %v743_v48 = vmax.f32 %v2202_v42, %v2205_v44  ;;  %v852_v42 = vld [vmem:[#allocation2 + $0x228] sm:$0xff] }
 0x1df   :  { %v740_v49 = vmax.f32 %v739_v46, %v628_v47  ;;  %v837_v46 = vld [vmem:[#allocation2 + $0x1b0] sm:$0xff]  ;;  %v838_v47 = vld [vmem:[#allocation2 + $0x1b8] sm:$0xff] }
 0x1e1   :  { %v1628_v50 = vpop.f32.mrb[12].mxu1 }
 0x1e2   :  { %v640_v51 = vpop.f32.mrb[13].mxu1  ;;  %v2211_v56 = vadd.f32 %v1628_v50, %v2184_v15 }
 0x1e3   :  { %v1629_v54 = vpop.f32.mrb[14].mxu1  ;;  %v641_v59 = vadd.f32 %v2184_v15, %v640_v51  ;;  %v1779_v51 = vpack.c.bf16 %v838_v47, %v837_v46 }
 0x1e4   :  { %v652_v57 = vadd.f32 %v1629_v54, %v2184_v15  ;;  %v643_v58 = vpop.f32.mrb[15].mxu1 }
 0x1e5   :  { %v644_v60 = vadd.f32 %v2184_v15, %v643_v58  ;;  %1780 = vmatprep.subr.bf16.mxu0 %v1779_v51  ;;  %v840_v58 = vld [vmem:[#allocation2 + $0x1c8] sm:$0xff] }
 0x1e6   :  { %v747_v61 = vmax.f32 %v2211_v56, %v652_v57  ;;  %1782 = vmatpush3.bf16.msra.mxu0 %v1781_v55  ;;  %v839_v57 = vld [vmem:[#allocation2 + $0x1c0] sm:$0xff] }
 0x1e7   :  { %v744_v62 = vmax.f32 %v641_v59, %v644_v60  ;;  %v1783_v60 = vpack.c.bf16 %v840_v58, %v839_v57 }
 0x1e9   :  { %v1632_v1 = vpop.f32.mrb[16].mxu1  ;;  %1784 = vmatprep.subr.bf16.mxu0 %v1783_v60 }
 0x1ea   :  { %v665_v5 = vadd.f32 %v1632_v1, %v2184_v15  ;;  %v656_v6 = vpop.f32.mrb[17].mxu1 }
 0x1eb   :  { %v1633_v9 = vpop.f32.mrb[18].mxu1  ;;  %v657_v16 = vadd.f32 %v2184_v15, %v656_v6  ;;  %v1787_v6 = vpack.c.bf16 %v842_v2, %v841_v63  ;;  %v847_v2 = vld [vmem:[#allocation2 + $0x200] sm:$0xff] }
 0x1ec   :  { %v745_v10 = vmax.f32 %v744_v62, %v665_v5  ;;  %v668_v11 = vadd.f32 %v1633_v9, %v2184_v15  ;;  %v659_v12 = vpop.f32.mrb[19].mxu1  ;;  %v824_v62 = vld [vmem:[#allocation2 + $0x148] sm:$0xff] }
 0x1ed   :  { %v660_v17 = vadd.f32 %v2184_v15, %v659_v12  ;;  %v1789_v12 = vpack.c.bf16 %v826_v4, %v825_v3  ;;  %v848_v3 = vld [vmem:[#allocation2 + $0x208] sm:$0xff] }
 0x1ee   :  { %v746_v21 = vmax.f32 %v745_v10, %v668_v11 }
 0x1ef   :  { %v750_v23 = vmax.f32 %v657_v16, %v660_v17  ;;  %v1791_v16 = vpack.c.bf16 %v844_v8, %v843_v7  ;;  %v827_v17 = vld [vmem:[#allocation2 + $0x160] sm:$0xff]  ;;  %v1800_v7 = vpack.c.bf16 %v848_v3, %v847_v2 }
 0x1f0   :  { %v1855_v24 = vpack.i.bf16 %v740_v49, %v746_v21  ;;  %v1793_v21 = vpack.c.bf16 %v828_v18, %v827_v17  ;;  %v1155_v17 = vld [vmem:[%s2404_s9] sm:$0xff]  ;;  %v1156_v18 = vld [vmem:[%s2404_s9 + $0x8] sm:$0xff] }
 0x1f1   :  { %v1636_v28 = vpop.f32.mrb[20].mxu1 }
 0x1f2   :  { %v681_v34 = vadd.f32 %v1636_v28, %v2184_v15  ;;  %v672_v36 = vpop.f32.mrb[21].mxu1  ;;  %1856 = vrot.lane.b32.xlu0 %v1855_v24, %s1946_s1 }
 0x1f3   :  { %v673_v38 = vadd.f32 %v2184_v15, %v672_v36  ;;  %v1637_v39 = vpop.f32.mrb[22].mxu1 }
 0x1f4   :  { %v2230_v40 = vmax.f32 %v750_v23, %v681_v34  ;;  %v2233_v41 = vadd.f32 %v1637_v39, %v2184_v15  ;;  %v675_v45 = vpop.f32.mrb[23].mxu1  ;;  %v830_v39 = vld [vmem:[#allocation2 + $0x178] sm:$0xff] }
 0x1f5   :  { %v2235_v49 = vmax.f32 %v747_v61, %v673_v38  ;;  %v2238_v50 = vadd.f32 %v2184_v15, %v675_v45  ;;  %v823_v61 = vld [vmem:[#allocation2 + $0x140] sm:$0xff]  ;;  %v829_v38 = vld [vmem:[#allocation2 + $0x170] sm:$0xff] }
 0x1f6   :  { %v752_v54 = vmax.f32 %v2230_v40, %v2233_v41  ;;  %v1785_v1 = vpack.c.bf16 %v824_v62, %v823_v61  ;;  %v1797_v46 = vpack.c.bf16 %v830_v39, %v829_v38  ;;  %v849_v41 = vld [vmem:[#allocation2 + $0x210] sm:$0xff]  ;;  %v1170_v39 = vld [vmem:[%s2404_s9 + $0x78] sm:$0xff] }
 0x1f7   :  { %v749_v56 = vmax.f32 %v2235_v49, %v2238_v50  ;;  %v1157_v49 = vld [vmem:[%s2404_s9 + $0x10] sm:$0xff] }
 0x1f8   :  { %1786 = vmatpush3.bf16.msra.mxu0 %v1785_v1  ;;  %v1169_v38 = vld [vmem:[%s2404_s9 + $0x70] sm:$0xff] }
 0x1f9   :  { %v1640_v59 = vpop.f32.mrb[24].mxu1  ;;  %1788 = vmatprep.subr.bf16.mxu0 %v1787_v6 }
 0x1fa   :  { %v688_v0 = vpop.f32.mrb[25].mxu1  ;;  %v697_v9 = vadd.f32 %v1640_v59, %v2184_v15 }
 0x1fb   :  { %v1641_v5 = vpop.f32.mrb[26].mxu1  ;;  %v689_v13 = vadd.f32 %v2184_v15, %v688_v0 }
 0x1fc   :  { %v700_v10 = vadd.f32 %v1641_v5, %v2184_v15  ;;  %v691_v11 = vpop.f32.mrb[27].mxu1  ;;  %1790 = vmatpush3.bf16.msra.mxu0 %v1789_v12 }
 0x1fd   :  { %v692_v14 = vadd.f32 %v2184_v15, %v691_v11  ;;  %1792 = vmatprep.subr.bf16.mxu0 %v1791_v16 }
 0x1fe   :  { %v756_v19 = vmax.f32 %v697_v9, %v700_v10  ;;  %v851_v9 = vld [vmem:[#allocation2 + $0x220] sm:$0xff] }
 0x1ff   :  { %v753_v20 = vmax.f32 %v689_v13, %v692_v14  ;;  %v1806_v44 = vpack.c.bf16 %v852_v42, %v851_v9 }
 0x200   :  { %1794 = vmatpush3.bf16.msra.mxu0 %v1793_v21 }
 0x201   :  { %v1644_v22 = vpop.f32.mrb[28].mxu1  ;;  %1796 = vmatprep.subr.bf16.mxu0 %v1795_v37 }
 0x202   :  { %v713_v23 = vadd.f32 %v1644_v22, %v2184_v15  ;;  %v704_v24 = vpop.f32.mrb[29].mxu1  ;;  %v1161_v22 = vld [vmem:[%s2404_s9 + $0x30] sm:$0xff] }
 0x203   :  { %v1645_v25 = vpop.f32.mrb[30].mxu1  ;;  %v705_v34 = vadd.f32 %v2184_v15, %v704_v24 }
 0x204   :  { %v2249_v26 = vmax.f32 %v753_v20, %v713_v23  ;;  %v2252_v28 = vadd.f32 %v1645_v25, %v2184_v15  ;;  %v707_v29 = vpop.f32.mrb[31].mxu1  ;;  %1798 = vmatpush3.bf16.msra.mxu0 %v1797_v46  ;;  %v1160_v20 = vld [vmem:[%s2404_s9 + $0x28] sm:$0xff]  ;;  %v1162_v23 = vld [vmem:[%s2404_s9 + $0x38] sm:$0xff]  ;;  %v1163_v25 = vld [vmem:[%s2404_s9 + $0x40] sm:$0xff] }
 0x205   :  { %v708_v36 = vadd.f32 %v2184_v15, %v707_v29  ;;  %1811 = vmatprep.subr.bf16.mxu0 %v1943_v31  ;;  %v1821_v24 = vpack.c.bf16 %v1162_v23, %v1161_v22  ;;  %v1165_v29 = vld [vmem:[%s2404_s9 + $0x50] sm:$0xff]  ;;  %v1249_v46 = vld [vmem:[%s2406_s11] sm:$0xff] }
 0x206   :  { %v755_v45 = vmax.f32 %v2249_v26, %v2252_v28  ;;  %v1164_v26 = vld [vmem:[%s2404_s9 + $0x48] sm:$0xff]  ;;  %v1827_v33 = vpack.c.bf16 %v1166_v32, %v1165_v29 }
 0x207   :  { %v759_v47 = vmax.f32 %v705_v34, %v708_v36  ;;  %v1824_v28 = vpack.c.bf16 %v1164_v26, %v1163_v25  ;;  %v1167_v34 = vld [vmem:[%s2404_s9 + $0x60] sm:$0xff]  ;;  %v1168_v36 = vld [vmem:[%s2404_s9 + $0x68] sm:$0xff] }
 0x208   :  { %v1830_v37 = vpack.c.bf16 %v1168_v36, %v1167_v34 }
 0x209   :  { %v1648_v51 = vpop.f32.mrb[32].mxu1  ;;  %v929_v14 = vpop.f32.mrb[36].mxu0 }
 0x20a   :  { %v729_v52 = vadd.f32 %v1648_v51, %v2184_v15  ;;  %v720_v53 = vpop.f32.mrb[33].mxu1  ;;  %v1658_v16 = vpop.f32.mrb[37].mxu0  ;;  %v1251_v51 = vld [vmem:[%s2406_s11 + $0x10] sm:$0xff] }
 0x20b   :  { %v721_v55 = vadd.f32 %v2184_v15, %v720_v53  ;;  %v1649_v57 = vpop.f32.mrb[34].mxu1  ;;  %v1252_v53 = vld [vmem:[%s2406_s11 + $0x18] sm:$0xff] }
 0x20c   :  { %v760_v58 = vmax.f32 %v759_v47, %v729_v52  ;;  %v732_v59 = vadd.f32 %v1649_v57, %v2184_v15  ;;  %v723_v60 = vpop.f32.mrb[35].mxu1  ;;  %v1250_v47 = vld [vmem:[%s2406_s11 + $0x8] sm:$0xff]  ;;  %v1253_v57 = vld [vmem:[%s2406_s11 + $0x20] sm:$0xff] }
 0x20d   :  { %v757_v61 = vmax.f32 %v756_v19, %v721_v55  ;;  %v724_v62 = vadd.f32 %v2184_v15, %v723_v60  ;;  %v1812_v19 = vpack.c.bf16 %v1156_v18, %v1155_v17  ;;  %v1836_v52 = vpack.c.bf16 %v1250_v47, %v1249_v46 }
 0x20e   :  { %v761_v63 = vmax.f32 %v760_v58, %v732_v59  ;;  %v1839_v55 = vpack.c.bf16 %v1252_v53, %v1251_v51  ;;  %v1254_v58 = vld [vmem:[%s2406_s11 + $0x28] sm:$0xff] }
 0x20f   :  { %v758_v0 = vmax.f32 %v757_v61, %v724_v62  ;;  %v1842_v59 = vpack.c.bf16 %v1254_v58, %v1253_v57 }
 0x211   :  { %v1860_v1 = vpack.i.bf16 %v752_v54, %v758_v0  ;;  %v850_v54 = vld [vmem:[#allocation2 + $0x218] sm:$0xff] }
 0x212   :  { %v1803_v8 = vpack.c.bf16 %v850_v54, %v849_v41  ;;  %v1256_v41 = vld [vmem:[%s2406_s11 + $0x38] sm:$0xff] }
 0x213   :  { %1861 = vrot.lane.b32.xlu0 %v1860_v1, %s1946_s1 }
 0x264   :  { %v1857_v4 = vpop.permute.xlu0 %1856 }
 0x265   :  { %v1859_v5 = vunpack.i.h.bf16 %v1857_v4  ;;  %v1858_v6 = vunpack.i.l.bf16 %v1857_v4 }
 0x267   :  { %v780_v15 = vsel %vm778_vm3, %v743_v48, %v1858_v6  ;;  %v779_v40 = vsel %vm778_vm3, %v737_v35, %v1859_v5  ;;  %v1809_v35 = vpack.c.bf16 %v854_v27, %v853_v30  ;;  %v1402_v6 = vld [vmem:[%s2403_s8] ss:$0 sm:$0xff] }
 0x268   :  { %1000 = vmatprep.mubr.f32.mxu1 %v780_v15  ;;  %v1404_v27 = vld [vmem:[%s2407_s12] ss:$0 sm:$0xff] }
 0x269   :  { %1001 = vmatmul.mubr.f32.vlgmr.msra.gmra.mrb[36].mxu1 %v779_v40 }
 0x26a   :  { %1801 = vmatpush3.bf16.msra.mxu1 %v1800_v7  ;;  %1675 = vmatprep.mubr.msk.f32.mxu1 %vm1945_vm1, %v1944_v43 }
 0x26b   :  { %1802 = vmatprep.subr.bf16.mxu1 %v1943_v31 }
 0x26e   :  { %1804 = vmatpush3.bf16.msra.mxu1 %v1803_v8  ;;  %v1403_v8 = vld [vmem:[%s2405_s10] ss:$0 sm:$0xff] }
 0x26f   :  { %1805 = vmatprep.subr.bf16.mxu1 %v1943_v31 }
 0x272   :  { %1807 = vmatpush3.bf16.msra.mxu1 %v1806_v44 }
 0x273   :  { %1808 = vmatprep.subr.bf16.mxu1 %v1943_v31 }
 0x276   :  { %1810 = vmatpush3.bf16.msra.mxu1 %v1809_v35 }
 0x277   :  { %1835 = vmatprep.subr.bf16.mxu1 %v1943_v31 }
 0x279   :  { %1676 = vmatmul.mubr.msk.f32.vlgmr.msra.gmra.mrb[38].mxu1 %vm778_vm3, %v761_v63 }
 0x27a   :  { %1729 = vmatprep.mubr.msk.f32.mxu1 %vm1945_vm1, %v1944_v43  ;;  %1837 = vmatpush3.bf16.msra.mxu1 %v1836_v52 }
 0x27b   :  { %1838 = vmatprep.subr.bf16.mxu1 %v1943_v31 }
 0x27e   :  { %1840 = vmatpush3.bf16.msra.mxu1 %v1839_v55 }
 0x27f   :  { %1841 = vmatprep.subr.bf16.mxu1 %v1943_v31 }
 0x282   :  { %1843 = vmatpush3.bf16.msra.mxu1 %v1842_v59 }
 0x283   :  { %1844 = vmatprep.subr.bf16.mxu1 %v1943_v31 }
 0x285   :  { %v1862_v48 = vpop.permute.xlu0 %1861 }
 0x286   :  { %v1864_v10 = vunpack.i.h.bf16 %v1862_v48  ;;  %v1863_v11 = vunpack.i.l.bf16 %v1862_v48 }
 0x288   :  { %v782_v12 = vsel %vm778_vm3, %v755_v45, %v1863_v11  ;;  %v781_v13 = vsel %vm778_vm3, %v749_v56, %v1864_v10  ;;  %v1159_v56 = vld [vmem:[%s2404_s9 + $0x20] sm:$0xff]  ;;  %v1833_v45 = vpack.c.bf16 %v1170_v39, %v1169_v38 }
 0x289   :  { %1070 = vmatprep.mubr.f32.mxu0 %v782_v12  ;;  %v1818_v21 = vpack.c.bf16 %v1160_v20, %v1159_v56 }
 0x28a   :  { %1071 = vmatmul.mubr.f32.vlgmr.msra.gmra.mrb[38].mxu0 %v781_v13 }
 0x28b   :  { %1710 = vmatprep.mubr.msk.f32.mxu0 %vm1945_vm1, %v1944_v43  ;;  %1813 = vmatpush3.bf16.msra.mxu0 %v1812_v19  ;;  %v1158_v43 = vld [vmem:[%s2404_s9 + $0x18] sm:$0xff] }
 0x28c   :  { %1814 = vmatprep.subr.bf16.mxu0 %v1943_v31  ;;  %v1815_v50 = vpack.c.bf16 %v1158_v43, %v1157_v49 }
 0x28f   :  { %1816 = vmatpush3.bf16.msra.mxu0 %v1815_v50 }
 0x290   :  { %1817 = vmatprep.subr.bf16.mxu0 %v1943_v31 }
 0x293   :  { %1819 = vmatpush3.bf16.msra.mxu0 %v1818_v21 }
 0x294   :  { %1820 = vmatprep.subr.bf16.mxu0 %v1943_v31 }
 0x297   :  { %1822 = vmatpush3.bf16.msra.mxu0 %v1821_v24 }
 0x298   :  { %1823 = vmatprep.subr.bf16.mxu0 %v1943_v31 }
 0x29b   :  { %1825 = vmatpush3.bf16.msra.mxu0 %v1824_v28 }
 0x29c   :  { %1826 = vmatprep.subr.bf16.mxu0 %v1943_v31 }
 0x29f   :  { %1828 = vmatpush3.bf16.msra.mxu0 %v1827_v33 }
 0x2a0   :  { %1829 = vmatprep.subr.bf16.mxu0 %v1943_v31 }
 0x2a3   :  { %1831 = vmatpush3.bf16.msra.mxu0 %v1830_v37 }
 0x2a4   :  { %1832 = vmatprep.subr.bf16.mxu0 %v1943_v31  ;;  %v1255_v31 = vld [vmem:[%s2406_s11 + $0x30] sm:$0xff]  ;;  %s1914_s11 = scalar_lea.vmem %s1345_s26, 128 }
 0x2a5   :  { %v1845_v54 = vpack.c.bf16 %v1256_v41, %v1255_v31  ;;  %p1915_p8 = scmp.ne.s32.totalorder %s1345_s26, %s1914_s11  ;;  %p1920_p10 = scmp.lt.s32.totalorder %s1914_s11, %s1914_s11 }
 0x2a7   :  { %1834 = vmatpush3.bf16.msra.mxu0 %v1833_v45  ;;  %1846 = vmatpush3.bf16.msra.mxu1 %v1845_v54  ;;  %p1921_p11 = por %p1920_p10, %p1919_p9 }
 0x2a9   :  { %p1922_p12 = pnand %p1921_p11, %p1915_p8 }
 0x33c   :  { %v1487_v60 = vpop.f32.mrb[36].mxu1 }
 0x33d   :  { %v1488_v61 = vpop.f32.mrb[37].mxu1 }
 0x33e   :  { %v1489_v62 = vadd.f32 %v1488_v61, %v1487_v60 }
 0x340   :  { %v1003_v63 = vadd.f32 %v1489_v62, %v929_v14 }
 0x34c   :  { %v1142_v0 = vpop.f32.mrb[38].mxu1 }
 0x34d   :  { %v1677_v1 = vpop.f32.mrb[39].mxu1 }
 0x35d   :  { %v1522_v2 = vpop.f32.mrb[38].mxu0 }
 0x35e   :  { %v1523_v3 = vpop.f32.mrb[39].mxu0 }
 0x35f   :  { %v1524_v4 = vadd.f32 %v1523_v3, %v1522_v2 }
 0x361   :  { %v1073_v5 = vadd.f32 %v1524_v4, %v1003_v63 }
 0x363   :  { %v1143_v7 = vadd.f32 %v1142_v0, %v1073_v5 }
 0x365   :  { %v1153_v15 = vadd.f32 %v1402_v6, %v1143_v7 }
 0x367   :  { %v1154_v40 = vmax.f32 %v1153_v15, 0.0 }
 0x369   :  { %1711 = vmatmul.mubr.f32.vlgmr.msra.gmra.mrb[40].mxu0 %v1154_v40 }
 0x43c   :  { %v1244_v9 = vpop.f32.mrb[40].mxu0 }
 0x43d   :  { %v1245_v42 = vadd.f32 %v1403_v8, %v1244_v9  ;;  %v1712_v44 = vpop.f32.mrb[41].mxu0 }
 0x43f   :  { %v1248_v30 = vmax.f32 %v1245_v42, 0.0 }
 0x441   :  { %1730 = vmatmul.mubr.msk.f32.vlgmr.msra.gmra.mrb[40].mxu1 %vm778_vm3, %v1248_v30 }
 0x514   :  { %v1333_v35 = vpop.f32.mrb[40].mxu1 }
 0x515   :  { %v1334_v48 = vadd.f32 %v1404_v27, %v1333_v35  ;;  %v1731_v10 = vpop.f32.mrb[41].mxu1 }
 0x517   :  { %1337 = vst [vmem:[#allocation5] sm:$0xff] %v1334_v48 }
 0x518   :  { %1925 = shalt.err (!%p1922_p12)
}
 0x519   :  { %s1926_s29 = scalar_lea.hbm %s2408_s13, 128 }
 0x51a   :  { %p1927_p13 = scmp.ne.s32.totalorder %s2408_s13, %s1926_s29  ;;  %p1930_p0 = scmp.lt.u32.totalorder %s1926_s29, %s2408_s13 }
 0x51c   :  { %p1932_p1 = pnand %p1930_p0, %p1927_p13 }
 0x51e   :  { %1935 = shalt.err (!%p1932_p1)
}
 0x51f   :  { %1347 = dma.vmem_to_hbm [thread:$0]  %s1345_s26, 128, %s2408_s13, [#allocation4]  }
 0x520   :  { %1938 = dma.done.wait [#allocation4], 128  }
 0x521   :  { %1939 = vsyncadd [#allocation4], 4294967168 }
 0x522   :  { %1351 = vsyncpa [#allocation3], 1 }
 0x523   :  { %1352 = vsyncpa [#allocation4], 1 }

</bundles_post_ra>
